<compile_context>
chip_gen: v6e
topology: v6e:2x2x1
jax: 0.10.0
libtpu: 0.0.40
codegen_flags: <defaults>
</compile_context>

<pallas_src>
import jax
import jax.numpy as jnp
from jax.experimental import pallas as pl
from jax.experimental.pallas import tpu as pltpu

_LANE = 128       # TPU lane width
_ROW_GRAIN = 16   # bf16 packs 2 rows per sublane -> natural (16, 128) tile grain


def _round_up(x, m):
    return ((x + m - 1) // m) * m


# --------------------------------------------------------------------------- #
# Kernel: fused 3-matmul MLP (Linear+ReLU, Linear+ReLU, Linear).
# bf16 operands feed the MXU; accumulation / bias / ReLU stay f32 on the VPU
# (v5e has no bf16 VPU path). Final store is bf16, 128-lane dense.
# --------------------------------------------------------------------------- #
def _mlp_kernel(x_ref, w0_ref, b0_ref, w1_ref, b1_ref, w2_ref, b2_ref, o_ref):
    h0 = jnp.dot(x_ref[...], w0_ref[...], preferred_element_type=jnp.float32)
    h0 = jnp.maximum(h0 + b0_ref[...], 0.0)

    h1 = jnp.dot(h0.astype(w1_ref.dtype), w1_ref[...],
                 preferred_element_type=jnp.float32)
    h1 = jnp.maximum(h1 + b1_ref[...], 0.0)

    out = jnp.dot(h1.astype(w2_ref.dtype), w2_ref[...],
                  preferred_element_type=jnp.float32)
    o_ref[...] = (out + b2_ref[...]).astype(o_ref.dtype)


def _tile_vmem_bytes(block_batch, in_dim, hid0, hid1, out_pad, cbytes):
    """Conservative per-kernel VMEM footprint estimate."""
    x_tiles = 2 * block_batch * in_dim * cbytes            # input, double-buffered
    o_tiles = 2 * block_batch * out_pad * cbytes           # bf16 output, double-buffered
    # Weights counted double-buffered (covers the no-Buffered(1) fallback path).
    weights = 2 * (in_dim * hid0 + hid0 * hid1 + hid1 * out_pad) * cbytes
    biases = 2 * (hid0 + hid1 + out_pad) * 4
    temps = 3 * block_batch * max(hid0, hid1, out_pad) * 4  # f32 h0/h1/out temporaries
    return x_tiles + o_tiles + weights + biases + temps


def prepare_params(params, *, compute_dtype=jnp.bfloat16):
    """One-time cast + pad of weights (hoisted out of the per-call hot path).

    Hidden dims and the output dim are zero-padded to multiples of 128 so the
    intermediates and all weight lane dims are lane-dense; zero columns/rows
    contribute nothing (relu(0 + 0) = 0), so results are unchanged.
    """
    (w0, b0), (w1, b1), (w2, b2) = params
    in_dim, h0 = w0.shape
    h1 = w1.shape[1]
    out_dim = w2.shape[1]
    hid0 = _round_up(max(h0, _LANE), _LANE)
    hid1 = _round_up(max(h1, _LANE), _LANE)
    out_pad = _round_up(max(out_dim, _LANE), _LANE)

    w0p = jnp.pad(w0, ((0, 0), (0, hid0 - h0))).astype(compute_dtype)
    b0p = jnp.pad(b0, (0, hid0 - h0)).reshape(1, hid0).astype(jnp.float32)
    w1p = jnp.pad(w1, ((0, hid0 - h0), (0, hid1 - h1))).astype(compute_dtype)
    b1p = jnp.pad(b1, (0, hid1 - h1)).reshape(1, hid1).astype(jnp.float32)
    w2p = jnp.pad(w2, ((0, hid1 - h1), (0, out_pad - out_dim))).astype(compute_dtype)
    b2p = jnp.pad(b2, (0, out_pad - out_dim)).reshape(1, out_pad).astype(jnp.float32)

    return dict(w0=w0p, b0=b0p, w1=w1p, b1=b1p, w2=w2p, b2=b2p,
                in_dim=in_dim, hid0=hid0, hid1=hid1,
                out_dim=out_dim, out_pad=out_pad,
                compute_dtype=compute_dtype)


def _resident_spec(shape, single_buffer):
    """Constant-index block: weights/biases stay resident across the grid."""
    if single_buffer:
        # Their index_map never changes -> a second pipeline buffer is wasted VMEM.
        return pl.BlockSpec(shape, lambda i: (0, 0), pipeline_mode=pl.Buffered(1))
    return pl.BlockSpec(shape, lambda i: (0, 0))


def _run_pallas(xp, p, block_batch, num_tiles, vmem_limit, single_buffer):
    in_dim, hid0, hid1, out_pad = p["in_dim"], p["hid0"], p["hid1"], p["out_pad"]
    return pl.pallas_call(
        _mlp_kernel,
        out_shape=jax.ShapeDtypeStruct((xp.shape[0], out_pad), p["compute_dtype"]),
        grid=(num_tiles,),
        in_specs=[
            pl.BlockSpec((block_batch, in_dim), lambda i: (i, 0)),   # x tile
            _resident_spec((in_dim, hid0), single_buffer),           # W0
            _resident_spec((1, hid0), single_buffer),                # b0
            _resident_spec((hid0, hid1), single_buffer),             # W1
            _resident_spec((1, hid1), single_buffer),                # b1
            _resident_spec((hid1, out_pad), single_buffer),          # W2
            _resident_spec((1, out_pad), single_buffer),             # b2
        ],
        out_specs=pl.BlockSpec((block_batch, out_pad), lambda i: (i, 0)),
        compiler_params=pltpu.CompilerParams(
            # Independent batch tiles -> megacore split on v7x; the multi-step
            # grid overlaps x/out DMA with compute on all generations.
            dimension_semantics=("parallel",),
            vmem_limit_bytes=vmem_limit,
        ),
    )(xp, p["w0"], p["b0"], p["w1"], p["b1"], p["w2"], p["b2"])


def linear_nn_forward(x, prepared, *, block_batch=None):
    """Fused 3-matmul MLP forward.  x: [B, input_size].  Returns f32 [B, out]."""
    p = prepared
    B = x.shape[0]
    in_dim, hid0, hid1, out_pad = p["in_dim"], p["hid0"], p["hid1"], p["out_pad"]
    cbytes = jnp.dtype(p["compute_dtype"]).itemsize

    # ---- VMEM budget / limit derived from the actual chip ------------------
    try:
        vmem_cap = int(pltpu.get_tpu_info().vmem_capacity_bytes)
    except Exception:
        vmem_cap = 64 << 20                       # assume the smallest (v7x per-core)
    vmem_ceiling = max(16 << 20, vmem_cap - (24 << 20))   # headroom for Mosaic scratch
    budget = min(24 << 20, (3 * vmem_ceiling) // 4)

    # ---- batch tiling: 16-row grain (bf16), big default, capped by budget --
    if block_batch is None:
        block_batch = 4096                        # >= ~1 MiB of x+out per grid step
    block_batch = max(_ROW_GRAIN, _round_up(block_batch, _ROW_GRAIN))
    block_batch = min(block_batch, _round_up(B, _ROW_GRAIN))
    while (block_batch > _ROW_GRAIN and
           _tile_vmem_bytes(block_batch, in_dim, hid0, hid1, out_pad,
                            cbytes) > budget):
        block_batch -= _ROW_GRAIN

    num_tiles = pl.cdiv(B, block_batch)
    # Megacore-friendly grid: prefer >= 2 tiles (even count) so both v7x
    # TensorCores get work from the single "parallel" batch axis.
    if num_tiles == 1 and B > _ROW_GRAIN:
        block_batch = max(_ROW_GRAIN, _round_up(pl.cdiv(B, 2), _ROW_GRAIN))
        num_tiles = pl.cdiv(B, block_batch)
    elif num_tiles > 1 and num_tiles % 2 == 1:
        cand = max(_ROW_GRAIN, _round_up(pl.cdiv(B, num_tiles + 1), _ROW_GRAIN))
        if pl.cdiv(B, cand) % 2 == 0:
            block_batch = cand
            num_tiles = pl.cdiv(B, cand)

    # ---- ragged batch: pad rows to the tile grain, slice off after ---------
    padded_b = num_tiles * block_batch
    xp = x.astype(p["compute_dtype"])             # single cast, no f32 detour
    if padded_b != B:
        xp = jnp.pad(xp, ((0, padded_b - B), (0, 0)))

    footprint = _tile_vmem_bytes(block_batch, in_dim, hid0, hid1, out_pad, cbytes)
    vmem_limit = int(min(max(int(1.25 * footprint), 16 << 20), vmem_ceiling))

    try:
        out = _run_pallas(xp, p, block_batch, num_tiles, vmem_limit,
                          single_buffer=True)
    except Exception:
        # pipeline_mode=pl.Buffered(1) unsupported on this JAX build -> fall
        # back to default double-buffered weight blocks (correctness identical).
        out = _run_pallas(xp, p, block_batch, num_tiles, vmem_limit,
                          single_buffer=False)

    return out[:B, :p["out_dim"]].astype(jnp.float32)


# --------------------------------------------------------------------------- #
# Parameter init + pure-JAX reference (for the smoke test).
# --------------------------------------------------------------------------- #
def init_params(key, input_size, hidden_size, output_size):
    """Deterministic init. Weights stored as [in, out] (transposed vs PyTorch)."""
    k0, k1, k2, k3, k4, k5 = jax.random.split(key, 6)

    def linear(kw, kb, fan_in, fan_out):
        bound = 1.0 / jnp.sqrt(fan_in)
        w = jax.random.uniform(kw, (fan_in, fan_out), jnp.float32, -bound, bound)
        b = jax.random.uniform(kb, (fan_out,), jnp.float32, -bound, bound)
        return w, b

    return (
        linear(k0, k1, input_size, hidden_size),    # fc_input
        linear(k2, k3, hidden_size, hidden_size),   # hidden_layers[0] (Linear)
        linear(k4, k5, hidden_size, output_size),   # fc_output
    )


def reference_forward(x, params):
    (w0, b0), (w1, b1), (w2, b2) = params
    h = jnp.maximum(x @ w0 + b0, 0.0)
    h = jnp.maximum(h @ w1 + b1, 0.0)
    return h @ w2 + b2


if __name__ == "__main__":
    # Small "tabular" shapes consistent with the module.  batch=37 is
    # deliberately ragged to exercise the cdiv/padding path; block_batch=16
    # yields a multi-step grid so the x/out DMA pipeline is actually engaged.
    batch, input_size, hidden_size, output_size = 37, 16, 32, 4

    key = jax.random.PRNGKey(0)
    kx, kp = jax.random.split(key)
    x = jax.random.normal(kx, (batch, input_size), dtype=jnp.float32)
    params = init_params(kp, input_size, hidden_size, output_size)

    prepped = prepare_params(params)              # one-time pad/cast of weights
    out = linear_nn_forward(x, prepped, block_batch=16)
    out = jax.block_until_ready(out)

    ref = reference_forward(x, params)
    assert out.shape == (batch, output_size)
    # bf16 matmul operands + bf16 output store -> loosened tolerance vs the
    # pure-f32 reference.
    assert jnp.allclose(out, ref, atol=5e-2, rtol=5e-2), "mismatch vs reference"

    print("KERNEL_OK")
</pallas_src>

<mosaic_0001>
module attributes {stable_mosaic.version = 11 : i64} {
  func.func @_mlp_kernel(%arg0: i32, %arg1: memref<16x16xbf16, #tpu.memory_space<vmem>>, %arg2: memref<16x128xbf16, #tpu.memory_space<vmem>>, %arg3: memref<1x128xf32, #tpu.memory_space<vmem>>, %arg4: memref<128x128xbf16, #tpu.memory_space<vmem>>, %arg5: memref<1x128xf32, #tpu.memory_space<vmem>>, %arg6: memref<128x128xbf16, #tpu.memory_space<vmem>>, %arg7: memref<1x128xf32, #tpu.memory_space<vmem>>, %arg8: memref<16x128xbf16, #tpu.memory_space<vmem>>) attributes {dimension_semantics = [#tpu.dimension_semantics<parallel>], iteration_bounds = array<i64: 3>, scalar_prefetch = 0 : i64, scratch_operands = 0 : i64, tpu.core_type = #tpu.core_type<tc>, window_params = [{transform_indices = @transform_0, window_bounds = array<i64: 16, 16>}, {pipeline_mode = #tpu.pipeline_mode<synchronous>, transform_indices = @transform_1, window_bounds = array<i64: 16, 128>}, {pipeline_mode = #tpu.pipeline_mode<synchronous>, transform_indices = @transform_2, window_bounds = array<i64: 1, 128>}, {pipeline_mode = #tpu.pipeline_mode<synchronous>, transform_indices = @transform_3, window_bounds = array<i64: 128, 128>}, {pipeline_mode = #tpu.pipeline_mode<synchronous>, transform_indices = @transform_4, window_bounds = array<i64: 1, 128>}, {pipeline_mode = #tpu.pipeline_mode<synchronous>, transform_indices = @transform_5, window_bounds = array<i64: 128, 128>}, {pipeline_mode = #tpu.pipeline_mode<synchronous>, transform_indices = @transform_6, window_bounds = array<i64: 1, 128>}, {transform_indices = @transform_7, window_bounds = array<i64: 16, 128>}]} {
    %c0 = arith.constant 0 : index
    %c0_0 = arith.constant 0 : index
    %0 = vector.load %arg1[%c0, %c0_0] : memref<16x16xbf16, #tpu.memory_space<vmem>>, vector<16x16xbf16>
    %c0_1 = arith.constant 0 : index
    %c0_2 = arith.constant 0 : index
    %1 = vector.load %arg2[%c0_1, %c0_2] : memref<16x128xbf16, #tpu.memory_space<vmem>>, vector<16x128xbf16>
    %cst = arith.constant dense<0.000000e+00> : vector<16x128xf32>
    %2 = tpu.matmul %0, %1, %cst {dimension_numbers = #tpu.dot_dimension_numbers<[1], [0], [0], [1], [0, 0, 1, 1], [], []>} : vector<16x16xbf16>, vector<16x128xbf16>, vector<16x128xf32> -> vector<16x128xf32>
    %c0_3 = arith.constant 0 : index
    %c0_4 = arith.constant 0 : index
    %3 = vector.load %arg3[%c0_3, %c0_4] : memref<1x128xf32, #tpu.memory_space<vmem>>, vector<1x128xf32>
    %4 = vector.broadcast %3 : vector<1x128xf32> to vector<16x128xf32>
    %5 = arith.addf %2, %4 : vector<16x128xf32>
    %cst_5 = arith.constant 0.000000e+00 : f32
    %6 = vector.broadcast %cst_5 : f32 to vector<16x128xf32>
    %7 = arith.maximumf %5, %6 : vector<16x128xf32>
    %8 = arith.truncf %7 : vector<16x128xf32> to vector<16x128xbf16>
    %c0_6 = arith.constant 0 : index
    %c0_7 = arith.constant 0 : index
    %9 = vector.load %arg4[%c0_6, %c0_7] : memref<128x128xbf16, #tpu.memory_space<vmem>>, vector<128x128xbf16>
    %cst_8 = arith.constant dense<0.000000e+00> : vector<16x128xf32>
    %10 = tpu.matmul %8, %9, %cst_8 {dimension_numbers = #tpu.dot_dimension_numbers<[1], [0], [0], [1], [0, 0, 1, 1], [], []>} : vector<16x128xbf16>, vector<128x128xbf16>, vector<16x128xf32> -> vector<16x128xf32>
    %c0_9 = arith.constant 0 : index
    %c0_10 = arith.constant 0 : index
    %11 = vector.load %arg5[%c0_9, %c0_10] : memref<1x128xf32, #tpu.memory_space<vmem>>, vector<1x128xf32>
    %12 = vector.broadcast %11 : vector<1x128xf32> to vector<16x128xf32>
    %13 = arith.addf %10, %12 : vector<16x128xf32>
    %cst_11 = arith.constant 0.000000e+00 : f32
    %14 = vector.broadcast %cst_11 : f32 to vector<16x128xf32>
    %15 = arith.maximumf %13, %14 : vector<16x128xf32>
    %16 = arith.truncf %15 : vector<16x128xf32> to vector<16x128xbf16>
    %c0_12 = arith.constant 0 : index
    %c0_13 = arith.constant 0 : index
    %17 = vector.load %arg6[%c0_12, %c0_13] : memref<128x128xbf16, #tpu.memory_space<vmem>>, vector<128x128xbf16>
    %cst_14 = arith.constant dense<0.000000e+00> : vector<16x128xf32>
    %18 = tpu.matmul %16, %17, %cst_14 {dimension_numbers = #tpu.dot_dimension_numbers<[1], [0], [0], [1], [0, 0, 1, 1], [], []>} : vector<16x128xbf16>, vector<128x128xbf16>, vector<16x128xf32> -> vector<16x128xf32>
    %c0_15 = arith.constant 0 : index
    %c0_16 = arith.constant 0 : index
    %19 = vector.load %arg7[%c0_15, %c0_16] : memref<1x128xf32, #tpu.memory_space<vmem>>, vector<1x128xf32>
    %20 = vector.broadcast %19 : vector<1x128xf32> to vector<16x128xf32>
    %21 = arith.addf %18, %20 : vector<16x128xf32>
    %22 = arith.truncf %21 : vector<16x128xf32> to vector<16x128xbf16>
    %c0_17 = arith.constant 0 : index
    %c0_18 = arith.constant 0 : index
    %23 = vector.load %arg8[%c0_17, %c0_18] : memref<16x128xbf16, #tpu.memory_space<vmem>>, vector<16x128xbf16>
    tpu.vector_store %arg8[%c0_17, %c0_18], %22 {strides = array<i32>} : memref<16x128xbf16, #tpu.memory_space<vmem>>, vector<16x128xbf16>,
    return
  }
  func.func @transform_0(%arg0: i32) -> (i32, i32) {
    %c0_i32 = arith.constant 0 : i32
    %c0_i32_0 = arith.constant 0 : i32
    return %arg0, %c0_i32 : i32, i32
  }
  func.func @transform_1(%arg0: i32) -> (i32, i32) {
    %c0_i32 = arith.constant 0 : i32
    %c0_i32_0 = arith.constant 0 : i32
    %c0_i32_1 = arith.constant 0 : i32
    return %c0_i32, %c0_i32_0 : i32, i32
  }
  func.func @transform_2(%arg0: i32) -> (i32, i32) {
    %c0_i32 = arith.constant 0 : i32
    %c0_i32_0 = arith.constant 0 : i32
    %c0_i32_1 = arith.constant 0 : i32
    return %c0_i32, %c0_i32_0 : i32, i32
  }
  func.func @transform_3(%arg0: i32) -> (i32, i32) {
    %c0_i32 = arith.constant 0 : i32
    %c0_i32_0 = arith.constant 0 : i32
    %c0_i32_1 = arith.constant 0 : i32
    return %c0_i32, %c0_i32_0 : i32, i32
  }
  func.func @transform_4(%arg0: i32) -> (i32, i32) {
    %c0_i32 = arith.constant 0 : i32
    %c0_i32_0 = arith.constant 0 : i32
    %c0_i32_1 = arith.constant 0 : i32
    return %c0_i32, %c0_i32_0 : i32, i32
  }
  func.func @transform_5(%arg0: i32) -> (i32, i32) {
    %c0_i32 = arith.constant 0 : i32
    %c0_i32_0 = arith.constant 0 : i32
    %c0_i32_1 = arith.constant 0 : i32
    return %c0_i32, %c0_i32_0 : i32, i32
  }
  func.func @transform_6(%arg0: i32) -> (i32, i32) {
    %c0_i32 = arith.constant 0 : i32
    %c0_i32_0 = arith.constant 0 : i32
    %c0_i32_1 = arith.constant 0 : i32
    return %c0_i32, %c0_i32_0 : i32, i32
  }
  func.func @transform_7(%arg0: i32) -> (i32, i32) {
    %c0_i32 = arith.constant 0 : i32
    %c0_i32_0 = arith.constant 0 : i32
    return %arg0, %c0_i32 : i32, i32
  }
}

module attributes {stable_mosaic.version = 11 : i64} {
  func.func @_mlp_kernel(%arg0: i32, %arg1: memref<16x16xbf16, #tpu.memory_space<vmem>>, %arg2: memref<16x128xbf16, #tpu.memory_space<vmem>>, %arg3: memref<1x128xf32, #tpu.memory_space<vmem>>, %arg4: memref<128x128xbf16, #tpu.memory_space<vmem>>, %arg5: memref<1x128xf32, #tpu.memory_space<vmem>>, %arg6: memref<128x128xbf16, #tpu.memory_space<vmem>>, %arg7: memref<1x128xf32, #tpu.memory_space<vmem>>, %arg8: memref<16x128xbf16, #tpu.memory_space<vmem>>) attributes {dimension_semantics = [#tpu.dimension_semantics<parallel>], iteration_bounds = array<i64: 3>, scalar_prefetch = 0 : i64, scratch_operands = 0 : i64, tpu.core_type = #tpu.core_type<tc>, window_params = [{transform_indices = @transform_0, window_bounds = array<i64: 16, 16>}, {pipeline_mode = #tpu.pipeline_mode<synchronous>, transform_indices = @transform_1, window_bounds = array<i64: 16, 128>}, {pipeline_mode = #tpu.pipeline_mode<synchronous>, transform_indices = @transform_2, window_bounds = array<i64: 1, 128>}, {pipeline_mode = #tpu.pipeline_mode<synchronous>, transform_indices = @transform_3, window_bounds = array<i64: 128, 128>}, {pipeline_mode = #tpu.pipeline_mode<synchronous>, transform_indices = @transform_4, window_bounds = array<i64: 1, 128>}, {pipeline_mode = #tpu.pipeline_mode<synchronous>, transform_indices = @transform_5, window_bounds = array<i64: 128, 128>}, {pipeline_mode = #tpu.pipeline_mode<synchronous>, transform_indices = @transform_6, window_bounds = array<i64: 1, 128>}, {transform_indices = @transform_7, window_bounds = array<i64: 16, 128>}]} {
    %c0 = arith.constant 0 : index
    %c0_0 = arith.constant 0 : index
    %0 = vector.load %arg1[%c0, %c0_0] : memref<16x16xbf16, #tpu.memory_space<vmem>>, vector<16x16xbf16>
    %c0_1 = arith.constant 0 : index
    %c0_2 = arith.constant 0 : index
    %1 = vector.load %arg2[%c0_1, %c0_2] : memref<16x128xbf16, #tpu.memory_space<vmem>>, vector<16x128xbf16>
    %cst = arith.constant dense<0.000000e+00> : vector<16x128xf32>
    %2 = tpu.matmul %0, %1, %cst {dimension_numbers = #tpu.dot_dimension_numbers<[1], [0], [0], [1], [0, 0, 1, 1], [], []>} : vector<16x16xbf16>, vector<16x128xbf16>, vector<16x128xf32> -> vector<16x128xf32>
    %c0_3 = arith.constant 0 : index
    %c0_4 = arith.constant 0 : index
    %3 = vector.load %arg3[%c0_3, %c0_4] : memref<1x128xf32, #tpu.memory_space<vmem>>, vector<1x128xf32>
    %4 = vector.broadcast %3 : vector<1x128xf32> to vector<16x128xf32>
    %5 = arith.addf %2, %4 : vector<16x128xf32>
    %cst_5 = arith.constant 0.000000e+00 : f32
    %6 = vector.broadcast %cst_5 : f32 to vector<16x128xf32>
    %7 = arith.maximumf %5, %6 : vector<16x128xf32>
    %8 = arith.truncf %7 : vector<16x128xf32> to vector<16x128xbf16>
    %c0_6 = arith.constant 0 : index
    %c0_7 = arith.constant 0 : index
    %9 = vector.load %arg4[%c0_6, %c0_7] : memref<128x128xbf16, #tpu.memory_space<vmem>>, vector<128x128xbf16>
    %cst_8 = arith.constant dense<0.000000e+00> : vector<16x128xf32>
    %10 = tpu.matmul %8, %9, %cst_8 {dimension_numbers = #tpu.dot_dimension_numbers<[1], [0], [0], [1], [0, 0, 1, 1], [], []>} : vector<16x128xbf16>, vector<128x128xbf16>, vector<16x128xf32> -> vector<16x128xf32>
    %c0_9 = arith.constant 0 : index
    %c0_10 = arith.constant 0 : index
    %11 = vector.load %arg5[%c0_9, %c0_10] : memref<1x128xf32, #tpu.memory_space<vmem>>, vector<1x128xf32>
    %12 = vector.broadcast %11 : vector<1x128xf32> to vector<16x128xf32>
    %13 = arith.addf %10, %12 : vector<16x128xf32>
    %cst_11 = arith.constant 0.000000e+00 : f32
    %14 = vector.broadcast %cst_11 : f32 to vector<16x128xf32>
    %15 = arith.maximumf %13, %14 : vector<16x128xf32>
    %16 = arith.truncf %15 : vector<16x128xf32> to vector<16x128xbf16>
    %c0_12 = arith.constant 0 : index
    %c0_13 = arith.constant 0 : index
    %17 = vector.load %arg6[%c0_12, %c0_13] : memref<128x128xbf16, #tpu.memory_space<vmem>>, vector<128x128xbf16>
    %cst_14 = arith.constant dense<0.000000e+00> : vector<16x128xf32>
    %18 = tpu.matmul %16, %17, %cst_14 {dimension_numbers = #tpu.dot_dimension_numbers<[1], [0], [0], [1], [0, 0, 1, 1], [], []>} : vector<16x128xbf16>, vector<128x128xbf16>, vector<16x128xf32> -> vector<16x128xf32>
    %c0_15 = arith.constant 0 : index
    %c0_16 = arith.constant 0 : index
    %19 = vector.load %arg7[%c0_15, %c0_16] : memref<1x128xf32, #tpu.memory_space<vmem>>, vector<1x128xf32>
    %20 = vector.broadcast %19 : vector<1x128xf32> to vector<16x128xf32>
    %21 = arith.addf %18, %20 : vector<16x128xf32>
    %22 = arith.truncf %21 : vector<16x128xf32> to vector<16x128xbf16>
    %c0_17 = arith.constant 0 : index
    %c0_18 = arith.constant 0 : index
    %23 = vector.load %arg8[%c0_17, %c0_18] : memref<16x128xbf16, #tpu.memory_space<vmem>>, vector<16x128xbf16>
    tpu.vector_store %arg8[%c0_17, %c0_18], %22 {strides = array<i32>} : memref<16x128xbf16, #tpu.memory_space<vmem>>, vector<16x128xbf16>,
    return
  }
  func.func @transform_0(%arg0: i32) -> (i32, i32) {
    %c0_i32 = arith.constant 0 : i32
    %c0_i32_0 = arith.constant 0 : i32
    return %arg0, %c0_i32 : i32, i32
  }
  func.func @transform_1(%arg0: i32) -> (i32, i32) {
    %c0_i32 = arith.constant 0 : i32
    %c0_i32_0 = arith.constant 0 : i32
    %c0_i32_1 = arith.constant 0 : i32
    return %c0_i32, %c0_i32_0 : i32, i32
  }
  func.func @transform_2(%arg0: i32) -> (i32, i32) {
    %c0_i32 = arith.constant 0 : i32
    %c0_i32_0 = arith.constant 0 : i32
    %c0_i32_1 = arith.constant 0 : i32
    return %c0_i32, %c0_i32_0 : i32, i32
  }
  func.func @transform_3(%arg0: i32) -> (i32, i32) {
    %c0_i32 = arith.constant 0 : i32
    %c0_i32_0 = arith.constant 0 : i32
    %c0_i32_1 = arith.constant 0 : i32
    return %c0_i32, %c0_i32_0 : i32, i32
  }
  func.func @transform_4(%arg0: i32) -> (i32, i32) {
    %c0_i32 = arith.constant 0 : i32
    %c0_i32_0 = arith.constant 0 : i32
    %c0_i32_1 = arith.constant 0 : i32
    return %c0_i32, %c0_i32_0 : i32, i32
  }
  func.func @transform_5(%arg0: i32) -> (i32, i32) {
    %c0_i32 = arith.constant 0 : i32
    %c0_i32_0 = arith.constant 0 : i32
    %c0_i32_1 = arith.constant 0 : i32
    return %c0_i32, %c0_i32_0 : i32, i32
  }
  func.func @transform_6(%arg0: i32) -> (i32, i32) {
    %c0_i32 = arith.constant 0 : i32
    %c0_i32_0 = arith.constant 0 : i32
    %c0_i32_1 = arith.constant 0 : i32
    return %c0_i32, %c0_i32_0 : i32, i32
  }
  func.func @transform_7(%arg0: i32) -> (i32, i32) {
    %c0_i32 = arith.constant 0 : i32
    %c0_i32_0 = arith.constant 0 : i32
    return %arg0, %c0_i32 : i32, i32
  }
}

</mosaic_0001>

<bundles_post_ra>
// kernel: tpu_custom_call.1
= control target key start
LH: loop header
LB: loop body
LE: loop exit
PB: predicated region body
PF: predicated region fallthrough
CT: control target
= control target key end

     0   :  { %12 = vsyncpa [#allocation3], 0  ;;  %s1262_s0 = inlined_call_operand.vmem [shape: bf16[48,16], index: 0, kind: input, shape index: {}]   ;;  %s1263_s1 = inlined_call_operand.vmem [shape: bf16[16,128], index: 1, kind: input, shape index: {}]   ;;  %s1264_s2 = inlined_call_operand.vmem [shape: f32[1,128], index: 2, kind: input, shape index: {}]   ;;  %s1265_s3 = inlined_call_operand.hbm [shape: bf16[128,128], index: 3, kind: input, shape index: {}]   ;;  %s1266_s4 = inlined_call_operand.vmem [shape: f32[1,128], index: 4, kind: input, shape index: {}]   ;;  %s1267_s5 = inlined_call_operand.hbm [shape: bf16[128,128], index: 5, kind: input, shape index: {}]   ;;  %s1268_s6 = inlined_call_operand.vmem [shape: f32[1,128], index: 6, kind: input, shape index: {}]   ;;  %s1269_s7 = inlined_call_operand.hbm [shape: bf16[48,128], index: 7, kind: output, shape index: {}]  }
   0x1   :  { %13 = vsyncpa [#allocation6], 0 }
   0x2   :  { %14 = vsyncpa [#allocation4], 0 }
   0x3   :  { %16 = vsyncpa [#allocation4 + $0x1], 0  ;;  %s1085_s24 = smov 0   ;;  %s1087_s25 = smov 0  }
   0x4   :  { %s1089_s26 = smov 0   ;;  %s1091_s27 = smov 0  }
   0x5 LB: > { %s1106_s28 = sadd.s32 4294967295, %s1034_s27   ;;  %s716_s29 = sadd.s32 4294967294, %s1034_s27   ;;  %s1034_s27 = sphi %s1091_s27, %s1283_s27   ;;  %s1030_s26 = sphi %s1089_s26, %s1282_s26   ;;  %s1026_s25 = sphi %s1087_s25, %s1281_s25   ;;  %s1022_s24 = sphi %s1085_s24, %s1280_s24  }
   0x6   : > { %s1110_s30 = sadd.s32 1, %s1034_s27   ;;  %s181_s8 = sadd.s32 1, %s1030_s26 }
   0x7   : > { %s178_s9 = ssub.s32 %s1034_s27, %s1110_s30  ;;  %p191_p0 = scmp.ne.s32.totalorder %s1030_s26, %s1026_s25 }
   0x8   : > { %p179_p1 = scmp.eq.s32.totalorder %s178_s9, 0  ;;  %p192_p2 = scmp.eq.s32.totalorder %s1106_s28, 2 }
   0x9   : > { %p197_p3 = scmp.ne.s32.totalorder %s1026_s25, %s1022_s24  ;;  %p198_p4 = scmp.eq.s32.totalorder %s716_s29, 2 }
   0xa   : > { %s1121_s10 = scalar_select %p179_p1, %s1030_s26, %s181_s8  }
   0xb   : > { %p1123_p5 = por %p192_p2, %p191_p0  ;;  %p1127_p6 = por %p198_p4, %p197_p3 }
   0xc   : > { %p717_p7 = scmp.ge.s32.totalorder %s1034_s27, 1  ;;  %p205_p8 = scmp.lt.s32.totalorder %s1034_s27, 4 }
   0xd   : > { %s1272_s12 = scalar_select %p1127_p6, 1, 0 }
   0xe   : > { %p1270_p9 = scmp.eq.s32.totalorder %s1106_s28, 0  ;;  %p1134_p10 = pnand %p717_p7, %p205_p8 }
   0xf   : > { %s1036_s14 = smov [#allocation2]   ;;  %s1037_s17 = smov [#allocation5]  }
  0x10   : > { %s223_s15 = sshll.u32 %s1036_s14, 4  ;;  %p840_p11 = pneg %p1134_p10  ;;  %s224_s15 = int_to_ptr.vmem [resolvable:$true] %s223_s15 }
  0x11   : > { %s239_s18 = sshll.u32 %s1037_s17, 4  ;;  %s925_s19 = scalar_lea.vmem %s224_s15, 1024  ;;  %s240_s18 = int_to_ptr.vmem [resolvable:$true] %s239_s18 }
  0x12   : > { %p1142_p12 = pnand %p1270_p9, %p840_p11  ;;  %p926_p0 = scmp.ne.s32.totalorder %s224_s15, %s925_s19 }
  0x13   : > { %p933_p3 = scmp.lt.s32.totalorder %s224_s15, %s224_s15  ;;  %p934_p4 = scmp.lt.s32.totalorder %s925_s19, %s925_s19 }
  0x14   : > { %p916_p13 = pneg %p1142_p12 }
  0x15   : > { %p935_p7 = por %p934_p4, %p933_p3 }
  0x16   : > { %p928_p1 = pnand %p926_p0, %p916_p13 }
  0x18   : > { %p929_p2 = pneg %p928_p1 }
  0x1a   : > { %p936_p8 = pnand %p935_p7, %p929_p2 }
  0x1c   : > { %939 = shalt.err (!%p936_p8)
}
  0x1d   : > { %s1038_s20 = smov 64   ;;  %s1039_s21 = smov 4  }
  0x1e   : > { %843 = dma.hbm_to_vmem [thread:$0]  (!%p1142_p12), %s1265_s3, 1024, %s224_s15, [#allocation3], %s1038_s20, %s1038_s20, %s1039_s21  }
  0x1f   : > { %s951_s29 = scalar_lea.vmem %s240_s18, 1024  ;;  %p959_p9 = scmp.lt.s32.totalorder %s240_s18, %s240_s18 }
  0x20   : > { %p952_p11 = scmp.ne.s32.totalorder %s240_s18, %s951_s29  ;;  %p960_p6 = scmp.lt.s32.totalorder %s951_s29, %s951_s29 }
  0x22   : > { %p954_p0 = pnand %p952_p11, %p916_p13  ;;  %p961_p3 = por %p960_p6, %p959_p9 }
  0x24   : > { %p955_p1 = pneg %p954_p0 }
  0x26   : > { %p962_p2 = pnand %p961_p3, %p955_p1 }
  0x28   : > { %965 = shalt.err (!%p962_p2)
}
  0x29   : > { %846 = dma.hbm_to_vmem [thread:$0]  (!%p1142_p12), %s1267_s5, 1024, %s240_s18, [#allocation6], %s1038_s20, %s1038_s20, %s1039_s21  }
  0x2a   : > { %267 = sbr.rel (%p1134_p10) target bundleno = 679 (0x2a7), region = 48  ;;  %p1275_p4 = scmp.eq.s32.totalorder (!%p1134_p10), %s1106_s28, 0 }
  0x2f   : > { %1009 = dma.done.wait (%p1275_p4), [#allocation3], 1024   ;;  %p1276_p13 = pmov %p1275_p4 }
  0x30   : > { %p1277_p7 = pmov %p1275_p4 }
  0x31   : > { %1011 = vsyncadd (%p1276_p13), [#allocation3], 4294966272 }
  0x32   : > { %1013 = dma.done.wait (%p1277_p7), [#allocation6], 1024   ;;  %p1278_p6 = pmov %p1275_p4 }
  0x33   : > { %s725_s14 = sshll.u32 %s1106_s28, 1  ;;  %v1040_v0 = vmov 0.0   ;;  %vm1041_vm0 = vmmov 0   ;;  %v896_v1 = vld [vmem:[%s1263_s1] sm:$0xff]   ;;  %vm333_vm1 = vcmask 130048   ;;  %v898_v3 = vld [vmem:[#allocation2 + $0x38] sm:$0xff]  }
  0x34   : > { %1015 = vsyncadd (%p1278_p6), [#allocation6], 4294966272  ;;  %784 = vmatprep.subr.bf16.mxu0 %v1040_v0  ;;  %786 = vmatprep.mubr.msk.bf16.mxu0 %vm1041_vm0, %v1040_v0  ;;  %p304_p9 = scmp.lt.s32.totalorder %s725_s14, 5  ;;  %v899_v4 = vld [vmem:[#allocation2 + $0x30] sm:$0xff]   ;;  %v900_v5 = vld [vmem:[#allocation2 + $0x28] sm:$0xff]   ;;  %s300_s29 = sand.u32 1, %s1026_s25  }
  0x35   : > { %790 = vmatprep.subr.bf16.mxu1 %v1040_v0  ;;  %806 = vmatprep.mubr.msk.bf16.mxu1 %vm1041_vm0, %v1040_v0  ;;  %v901_v6 = vld [vmem:[#allocation2 + $0x20] sm:$0xff]   ;;  %v902_v7 = vld [vmem:[#allocation2 + $0x18] sm:$0xff]   ;;  %v903_v8 = vld [vmem:[#allocation2 + $0x10] sm:$0xff]   ;;  %s724_s8 = sshll.u32 %s300_s29, 3  ;;  %s758_s16 = sshll.u32 %s1106_s28, 7 }
  0x36   : > { %s1285_s14 = smov (!%p304_p9, %s725_s14), 5  ;;  %785 = vmatpush3.bf16.msra.mxu0 %v896_v1  ;;  %791 = vmatpush3.bf16.msra.mxu1 %v898_v3  ;;  %v904_v9 = vld [vmem:[#allocation2 + $0x8] sm:$0xff]   ;;  %v905_v10 = vld [vmem:[#allocation2] sm:$0xff]   ;;  %v906_v11 = vld [vmem:[#allocation5 + $0x38] sm:$0xff]   ;;  %s1220_s19 = scalar_lea.hbm %s1269_s7, %s758_s16 }
  0x37   : > { %s726_s13 = sshll.u32 %s1285_s14, 2  ;;  %810 = vmatprep.subr.bf16.mxu0 %v1040_v0  ;;  %792 = vmatprep.subr.bf16.mxu1 %v1040_v0  ;;  %v907_v12 = vld [vmem:[#allocation5 + $0x30] sm:$0xff]   ;;  %v908_v13 = vld [vmem:[#allocation5 + $0x28] sm:$0xff]   ;;  %v909_v14 = vld [vmem:[#allocation5 + $0x20] sm:$0xff]   ;;  %s1222_s20 = scalar_lea.sflag [#allocation4], %s300_s29 }
  0x38   : > { %s307_s17 = scalar_lea.vmem %s1262_s0, %s726_s13  ;;  %v910_v15 = vld [vmem:[#allocation5 + $0x18] sm:$0xff]   ;;  %v727_v16 = vld [vmem:[%s1264_s2] ss:$0 sm:$0xff]  ;;  %v911_v26 = vld [vmem:[#allocation5 + $0x10] sm:$0xff]   ;;  %s302_s13 = scalar_lea.vmem [#allocation7], %s724_s8 }
  0x39   : > { %v897_v2 = vld [vmem:[%s307_s17] sm:$0xff]   ;;  %v912_v27 = vld [vmem:[#allocation5 + $0x8] sm:$0xff]   ;;  %s632_s15 = sshll.u32 %s302_s13, 4  ;;  %s1042_s28 = smov [#allocation7]   ;;  %s1215_s15 = int_to_ptr.vmem [resolvable:$true] %s632_s15 }
  0x3a   : > { %787 = vmatmul.mubr.msk.bf16.vlgmr.msra.gmra.mxu0 %vm333_vm1, %v897_v2  ;;  %793 = vmatpush3.bf16.msra.mxu1 %v899_v4  ;;  %v913_v28 = vld [vmem:[#allocation5] sm:$0xff]   ;;  %s966_s21 = scalar_lea.vmem %s1215_s15, 128  ;;  %s970_s22 = sshll.u32 %s1042_s28, 4  ;;  %s971_s22 = int_to_ptr.vmem [resolvable:$false] %s970_s22 }
  0x3b   : > { %826 = vmatprep.mubr.msk.bf16.mxu0 %vm1041_vm0, %v1040_v0  ;;  %794 = vmatprep.subr.bf16.mxu1 %v1040_v0  ;;  %v731_v29 = vld [vmem:[%s1266_s4] ss:$0 sm:$0xff]  ;;  %p967_p10 = scmp.ne.s32.totalorder %s1215_s15, %s966_s21  ;;  %s972_s23 = scalar_lea.vmem %s971_s22, 256 }
  0x3c   : > { %811 = vmatpush3.bf16.msra.mxu0 %v906_v11  ;;  %v740_v40 = vld [vmem:[%s1268_s6] ss:$0 sm:$0xff]  ;;  %p973_p11 = scmp.lt.s32.totalorder %s1215_s15, %s971_s22  ;;  %p974_p0 = scmp.lt.s32.totalorder %s972_s23, %s966_s21 }
  0x3d   : > { %812 = vmatprep.subr.bf16.mxu0 %v1040_v0  ;;  %p968_p12 = pnand %p967_p10, %p1123_p5 }
  0x3e   : > { %795 = vmatpush3.bf16.msra.mxu1 %v900_v5  ;;  %p975_p1 = por %p974_p0, %p973_p11 }
  0x3f   : > { %796 = vmatprep.subr.bf16.mxu1 %v1040_v0  ;;  %p969_p8 = pneg %p968_p12 }
  0x40   : > { %813 = vmatpush3.bf16.msra.mxu0 %v907_v12 }
  0x41   : > { %814 = vmatprep.subr.bf16.mxu0 %v1040_v0  ;;  %p976_p3 = pnand %p975_p1, %p969_p8 }
  0x42   : > { %797 = vmatpush3.bf16.msra.mxu1 %v901_v6 }
  0x43   : > { %798 = vmatprep.subr.bf16.mxu1 %v1040_v0 }
  0x44   : > { %815 = vmatpush3.bf16.msra.mxu0 %v908_v13 }
  0x45   : > { %816 = vmatprep.subr.bf16.mxu0 %v1040_v0 }
  0x46   : > { %799 = vmatpush3.bf16.msra.mxu1 %v902_v7 }
  0x47   : > { %800 = vmatprep.subr.bf16.mxu1 %v1040_v0 }
  0x48   : > { %817 = vmatpush3.bf16.msra.mxu0 %v909_v14 }
  0x49   : > { %818 = vmatprep.subr.bf16.mxu0 %v1040_v0 }
  0x4a   : > { %801 = vmatpush3.bf16.msra.mxu1 %v903_v8 }
  0x4b   : > { %802 = vmatprep.subr.bf16.mxu1 %v1040_v0 }
  0x4c   : > { %819 = vmatpush3.bf16.msra.mxu0 %v910_v15 }
  0x4d   : > { %820 = vmatprep.subr.bf16.mxu0 %v1040_v0 }
  0x4e   : > { %803 = vmatpush3.bf16.msra.mxu1 %v904_v9 }
  0x4f   : > { %804 = vmatprep.subr.bf16.mxu1 %v1040_v0 }
  0x50   : > { %821 = vmatpush3.bf16.msra.mxu0 %v911_v26 }
  0x51   : > { %822 = vmatprep.subr.bf16.mxu0 %v1040_v0 }
  0x52   : > { %805 = vmatpush3.bf16.msra.mxu1 %v905_v10 }
  0x54   : > { %823 = vmatpush3.bf16.msra.mxu0 %v912_v27 }
  0x55   : > { %824 = vmatprep.subr.bf16.mxu0 %v1040_v0 }
  0x58   : > { %825 = vmatpush3.bf16.msra.mxu0 %v913_v28 }
  0xfa   : > { %v371_v17 = vpop.f32.mrf.mxu0 }
  0xfb   : > { %v372_v19 = vadd.f32 %v727_v16, %v371_v17 }
  0xfc   : > { %v788_v18 = vpop.f32.mrf.mxu0 }
  0xfd   : > { %v378_v23 = vmax.f32 %v372_v19, 0.0 }
  0xfe   : > { %v374_v20 = vpop.f32.mrf.mxu0 }
  0xff   : > { %v375_v21 = vadd.f32 %v727_v16, %v374_v20 }
 0x100   : > { %v789_v22 = vpop.f32.mrf.mxu0 }
 0x101   : > { %v379_v24 = vmax.f32 %v375_v21, 0.0 }
 0x103   : > { %v380_v25 = vpack.c.bf16 %v379_v24, %v378_v23 }
 0x105   : > { %807 = vmatmul.mubr.bf16.vlgmr.msra.gmra.mxu1 %v380_v25 }
 0x1c5   : > { %v486_v30 = vpop.f32.mrf.mxu1 }
 0x1c6   : > { %v487_v32 = vadd.f32 %v731_v29, %v486_v30 }
 0x1c7   : > { %v808_v31 = vpop.f32.mrf.mxu1 }
 0x1c8   : > { %v493_v36 = vmax.f32 %v487_v32, 0.0 }
 0x1c9   : > { %v489_v33 = vpop.f32.mrf.mxu1 }
 0x1ca   : > { %v490_v34 = vadd.f32 %v731_v29, %v489_v33 }
 0x1cb   : > { %v809_v35 = vpop.f32.mrf.mxu1 }
 0x1cc   : > { %v494_v37 = vmax.f32 %v490_v34, 0.0 }
 0x1ce   : > { %v495_v38 = vpack.c.bf16 %v494_v37, %v493_v36 }
 0x1d0   : > { %827 = vmatmul.mubr.bf16.vlgmr.msra.gmra.mxu0 %v495_v38 }
 0x290   : > { %v601_v39 = vpop.f32.mrf.mxu0 }
 0x291   : > { %v602_v43 = vadd.f32 %v740_v40, %v601_v39 }
 0x292   : > { %v828_v41 = vpop.f32.mrf.mxu0 }
 0x294   : > { %v604_v42 = vpop.f32.mrf.mxu0 }
 0x295   : > { %v605_v44 = vadd.f32 %v740_v40, %v604_v42 }
 0x296   : > { %v829_v45 = vpop.f32.mrf.mxu0 }
 0x297   : > { %v762_v46 = vpack.c.bf16 %v605_v44, %v602_v43 }
 0x299   : > { %763 = vst [vmem:[%s302_s13] sm:$0xff] %v762_v46  }
 0x29a   : > { %979 = shalt.err (!%p976_p3)
}
 0x29b   : > { %s980_s29 = scalar_lea.hbm %s1220_s19, 128  ;;  %s984_s14 = scalar_lea.hbm %s1269_s7, 384 }
 0x29c   : > { %p981_p2 = scmp.ne.s32.totalorder %s1220_s19, %s980_s29  ;;  %p985_p7 = scmp.lt.s32.totalorder %s1220_s19, %s1269_s7 }
 0x29d   : > { %p986_p6 = scmp.lt.s32.totalorder %s984_s14, %s980_s29 }
 0x29e   : > { %p982_p4 = pnand %p981_p2, %p1123_p5 }
 0x29f   : > { %p987_p9 = por %p986_p6, %p985_p7 }
 0x2a0   : > { %p983_p13 = pneg %p982_p4 }
 0x2a2   : > { %p988_p10 = pnand %p987_p9, %p983_p13 }
 0x2a4   : > { %991 = shalt.err (!%p988_p10)
}
 0x2a5   : > { %s1043_s17 = smov 64   ;;  %s1044_s18 = smov 4  }
 0x2a6   : > { %838 = dma.vmem_to_hbm [thread:$0]  (%p1123_p5), %s1215_s15, 128, %s1220_s19, %s1222_s20, %s1043_s17, %s1043_s17, %s1044_s18  }
 0x2a7 PF: > { %p855_p12 = scmp.ge.s32.totalorder %s1034_s27, 2  ;;  %s647_s21 = sand.u32 1, %s1022_s24  }
 0x2a8   : > { %p1279_p8 = scmp.ne.s32.totalorder %s1272_s12, 0  ;;  %s648_s28 = scalar_lea.sflag [#allocation4], %s647_s21 }
 0x2aa   : > { %p848_p11 = pnand %p855_p12, %p1279_p8 }
 0x2ac   : > { %p849_p0 = pneg %p848_p11 }
 0x2ae   : > { %1017 = dma.done.wait (%p849_p0), %s648_s28, 128  }
 0x2af   : > { %1019 = vsyncadd (%p849_p0), %s648_s28, 4294967168  ;;  %p19_p1 = scmp.ge.s32.totalorder %s1110_s30, 5   ;;  %s1280_s24 = smov %s1026_s25 }
 0x2b0   : > { %s1281_s25 = smov %s1030_s26  ;;  %s1282_s26 = smov %s1121_s10 }
 0x2b1   : > { %s1283_s27 = smov %s1110_s30  ;;  %21 = sbr.rel (!%p19_p1) target bundleno = 5 (0x5), region = 92 }
 0x2b6   :  { %653 = vsyncpa [#allocation3], 1 }
 0x2b7   :  { %655 = vsyncpa [#allocation3 + $0x1], 1 }
 0x2b8   :  { %656 = vsyncpa [#allocation6], 1 }
 0x2b9   :  { %657 = vsyncpa [#allocation4], 1 }
 0x2ba   :  { %659 = vsyncpa [#allocation4 + $0x1], 1 }

// kernel: tpu_custom_call.1
= control target key start
LH: loop header
LB: loop body
LE: loop exit
PB: predicated region body
PF: predicated region fallthrough
CT: control target
= control target key end

     0   :  { %12 = vsyncpa [#allocation3], 0  ;;  %s1262_s0 = inlined_call_operand.vmem [shape: bf16[48,16], index: 0, kind: input, shape index: {}]   ;;  %s1263_s1 = inlined_call_operand.vmem [shape: bf16[16,128], index: 1, kind: input, shape index: {}]   ;;  %s1264_s2 = inlined_call_operand.vmem [shape: f32[1,128], index: 2, kind: input, shape index: {}]   ;;  %s1265_s3 = inlined_call_operand.hbm [shape: bf16[128,128], index: 3, kind: input, shape index: {}]   ;;  %s1266_s4 = inlined_call_operand.vmem [shape: f32[1,128], index: 4, kind: input, shape index: {}]   ;;  %s1267_s5 = inlined_call_operand.hbm [shape: bf16[128,128], index: 5, kind: input, shape index: {}]   ;;  %s1268_s6 = inlined_call_operand.vmem [shape: f32[1,128], index: 6, kind: input, shape index: {}]   ;;  %s1269_s7 = inlined_call_operand.hbm [shape: bf16[48,128], index: 7, kind: output, shape index: {}]  }
   0x1   :  { %13 = vsyncpa [#allocation6], 0 }
   0x2   :  { %14 = vsyncpa [#allocation4], 0 }
   0x3   :  { %16 = vsyncpa [#allocation4 + $0x1], 0  ;;  %s1085_s24 = smov 0   ;;  %s1087_s25 = smov 0  }
   0x4   :  { %s1089_s26 = smov 0   ;;  %s1091_s27 = smov 0  }
   0x5 LB: > { %s1106_s28 = sadd.s32 4294967295, %s1034_s27   ;;  %s716_s29 = sadd.s32 4294967294, %s1034_s27   ;;  %s1034_s27 = sphi %s1091_s27, %s1283_s27   ;;  %s1030_s26 = sphi %s1089_s26, %s1282_s26   ;;  %s1026_s25 = sphi %s1087_s25, %s1281_s25   ;;  %s1022_s24 = sphi %s1085_s24, %s1280_s24  }
   0x6   : > { %s1110_s30 = sadd.s32 1, %s1034_s27   ;;  %s181_s8 = sadd.s32 1, %s1030_s26 }
   0x7   : > { %s178_s9 = ssub.s32 %s1034_s27, %s1110_s30  ;;  %p191_p0 = scmp.ne.s32.totalorder %s1030_s26, %s1026_s25 }
   0x8   : > { %p179_p1 = scmp.eq.s32.totalorder %s178_s9, 0  ;;  %p192_p2 = scmp.eq.s32.totalorder %s1106_s28, 2 }
   0x9   : > { %p197_p3 = scmp.ne.s32.totalorder %s1026_s25, %s1022_s24  ;;  %p198_p4 = scmp.eq.s32.totalorder %s716_s29, 2 }
   0xa   : > { %s1121_s10 = scalar_select %p179_p1, %s1030_s26, %s181_s8  }
   0xb   : > { %p1123_p5 = por %p192_p2, %p191_p0  ;;  %p1127_p6 = por %p198_p4, %p197_p3 }
   0xc   : > { %p717_p7 = scmp.ge.s32.totalorder %s1034_s27, 1  ;;  %p205_p8 = scmp.lt.s32.totalorder %s1034_s27, 4 }
   0xd   : > { %s1272_s12 = scalar_select %p1127_p6, 1, 0 }
   0xe   : > { %p1270_p9 = scmp.eq.s32.totalorder %s1106_s28, 0  ;;  %p1134_p10 = pnand %p717_p7, %p205_p8 }
   0xf   : > { %s1036_s14 = smov [#allocation2]   ;;  %s1037_s17 = smov [#allocation5]  }
  0x10   : > { %s223_s15 = sshll.u32 %s1036_s14, 4  ;;  %p840_p11 = pneg %p1134_p10  ;;  %s224_s15 = int_to_ptr.vmem [resolvable:$true] %s223_s15 }
  0x11   : > { %s239_s18 = sshll.u32 %s1037_s17, 4  ;;  %s925_s19 = scalar_lea.vmem %s224_s15, 1024  ;;  %s240_s18 = int_to_ptr.vmem [resolvable:$true] %s239_s18 }
  0x12   : > { %p1142_p12 = pnand %p1270_p9, %p840_p11  ;;  %p926_p0 = scmp.ne.s32.totalorder %s224_s15, %s925_s19 }
  0x13   : > { %p933_p3 = scmp.lt.s32.totalorder %s224_s15, %s224_s15  ;;  %p934_p4 = scmp.lt.s32.totalorder %s925_s19, %s925_s19 }
  0x14   : > { %p916_p13 = pneg %p1142_p12 }
  0x15   : > { %p935_p7 = por %p934_p4, %p933_p3 }
  0x16   : > { %p928_p1 = pnand %p926_p0, %p916_p13 }
  0x18   : > { %p929_p2 = pneg %p928_p1 }
  0x1a   : > { %p936_p8 = pnand %p935_p7, %p929_p2 }
  0x1c   : > { %939 = shalt.err (!%p936_p8)
}
  0x1d   : > { %s1038_s20 = smov 64   ;;  %s1039_s21 = smov 4  }
  0x1e   : > { %843 = dma.hbm_to_vmem [thread:$0]  (!%p1142_p12), %s1265_s3, 1024, %s224_s15, [#allocation3], %s1038_s20, %s1038_s20, %s1039_s21  }
  0x1f   : > { %s951_s29 = scalar_lea.vmem %s240_s18, 1024  ;;  %p959_p9 = scmp.lt.s32.totalorder %s240_s18, %s240_s18 }
  0x20   : > { %p952_p11 = scmp.ne.s32.totalorder %s240_s18, %s951_s29  ;;  %p960_p6 = scmp.lt.s32.totalorder %s951_s29, %s951_s29 }
  0x22   : > { %p954_p0 = pnand %p952_p11, %p916_p13  ;;  %p961_p3 = por %p960_p6, %p959_p9 }
  0x24   : > { %p955_p1 = pneg %p954_p0 }
  0x26   : > { %p962_p2 = pnand %p961_p3, %p955_p1 }
  0x28   : > { %965 = shalt.err (!%p962_p2)
}
  0x29   : > { %846 = dma.hbm_to_vmem [thread:$0]  (!%p1142_p12), %s1267_s5, 1024, %s240_s18, [#allocation6], %s1038_s20, %s1038_s20, %s1039_s21  }
  0x2a   : > { %267 = sbr.rel (%p1134_p10) target bundleno = 679 (0x2a7), region = 48  ;;  %p1275_p4 = scmp.eq.s32.totalorder (!%p1134_p10), %s1106_s28, 0 }
  0x2f   : > { %1009 = dma.done.wait (%p1275_p4), [#allocation3], 1024   ;;  %p1276_p13 = pmov %p1275_p4 }
  0x30   : > { %p1277_p7 = pmov %p1275_p4 }
  0x31   : > { %1011 = vsyncadd (%p1276_p13), [#allocation3], 4294966272 }
  0x32   : > { %1013 = dma.done.wait (%p1277_p7), [#allocation6], 1024   ;;  %p1278_p6 = pmov %p1275_p4 }
  0x33   : > { %s725_s14 = sshll.u32 %s1106_s28, 1  ;;  %v1040_v0 = vmov 0.0   ;;  %vm1041_vm0 = vmmov 0   ;;  %v896_v1 = vld [vmem:[%s1263_s1] sm:$0xff]   ;;  %vm333_vm1 = vcmask 130048   ;;  %v898_v3 = vld [vmem:[#allocation2 + $0x38] sm:$0xff]  }
  0x34   : > { %1015 = vsyncadd (%p1278_p6), [#allocation6], 4294966272  ;;  %784 = vmatprep.subr.bf16.mxu0 %v1040_v0  ;;  %786 = vmatprep.mubr.msk.bf16.mxu0 %vm1041_vm0, %v1040_v0  ;;  %p304_p9 = scmp.lt.s32.totalorder %s725_s14, 5  ;;  %v899_v4 = vld [vmem:[#allocation2 + $0x30] sm:$0xff]   ;;  %v900_v5 = vld [vmem:[#allocation2 + $0x28] sm:$0xff]   ;;  %s300_s29 = sand.u32 1, %s1026_s25  }
  0x35   : > { %790 = vmatprep.subr.bf16.mxu1 %v1040_v0  ;;  %806 = vmatprep.mubr.msk.bf16.mxu1 %vm1041_vm0, %v1040_v0  ;;  %v901_v6 = vld [vmem:[#allocation2 + $0x20] sm:$0xff]   ;;  %v902_v7 = vld [vmem:[#allocation2 + $0x18] sm:$0xff]   ;;  %v903_v8 = vld [vmem:[#allocation2 + $0x10] sm:$0xff]   ;;  %s724_s8 = sshll.u32 %s300_s29, 3  ;;  %s758_s16 = sshll.u32 %s1106_s28, 7 }
  0x36   : > { %s1285_s14 = smov (!%p304_p9, %s725_s14), 5  ;;  %785 = vmatpush3.bf16.msra.mxu0 %v896_v1  ;;  %791 = vmatpush3.bf16.msra.mxu1 %v898_v3  ;;  %v904_v9 = vld [vmem:[#allocation2 + $0x8] sm:$0xff]   ;;  %v905_v10 = vld [vmem:[#allocation2] sm:$0xff]   ;;  %v906_v11 = vld [vmem:[#allocation5 + $0x38] sm:$0xff]   ;;  %s1220_s19 = scalar_lea.hbm %s1269_s7, %s758_s16 }
  0x37   : > { %s726_s13 = sshll.u32 %s1285_s14, 2  ;;  %810 = vmatprep.subr.bf16.mxu0 %v1040_v0  ;;  %792 = vmatprep.subr.bf16.mxu1 %v1040_v0  ;;  %v907_v12 = vld [vmem:[#allocation5 + $0x30] sm:$0xff]   ;;  %v908_v13 = vld [vmem:[#allocation5 + $0x28] sm:$0xff]   ;;  %v909_v14 = vld [vmem:[#allocation5 + $0x20] sm:$0xff]   ;;  %s1222_s20 = scalar_lea.sflag [#allocation4], %s300_s29 }
  0x38   : > { %s307_s17 = scalar_lea.vmem %s1262_s0, %s726_s13  ;;  %v910_v15 = vld [vmem:[#allocation5 + $0x18] sm:$0xff]   ;;  %v727_v16 = vld [vmem:[%s1264_s2] ss:$0 sm:$0xff]  ;;  %v911_v26 = vld [vmem:[#allocation5 + $0x10] sm:$0xff]   ;;  %s302_s13 = scalar_lea.vmem [#allocation7], %s724_s8 }
  0x39   : > { %v897_v2 = vld [vmem:[%s307_s17] sm:$0xff]   ;;  %v912_v27 = vld [vmem:[#allocation5 + $0x8] sm:$0xff]   ;;  %s632_s15 = sshll.u32 %s302_s13, 4  ;;  %s1042_s28 = smov [#allocation7]   ;;  %s1215_s15 = int_to_ptr.vmem [resolvable:$true] %s632_s15 }
  0x3a   : > { %787 = vmatmul.mubr.msk.bf16.vlgmr.msra.gmra.mxu0 %vm333_vm1, %v897_v2  ;;  %793 = vmatpush3.bf16.msra.mxu1 %v899_v4  ;;  %v913_v28 = vld [vmem:[#allocation5] sm:$0xff]   ;;  %s966_s21 = scalar_lea.vmem %s1215_s15, 128  ;;  %s970_s22 = sshll.u32 %s1042_s28, 4  ;;  %s971_s22 = int_to_ptr.vmem [resolvable:$false] %s970_s22 }
  0x3b   : > { %826 = vmatprep.mubr.msk.bf16.mxu0 %vm1041_vm0, %v1040_v0  ;;  %794 = vmatprep.subr.bf16.mxu1 %v1040_v0  ;;  %v731_v29 = vld [vmem:[%s1266_s4] ss:$0 sm:$0xff]  ;;  %p967_p10 = scmp.ne.s32.totalorder %s1215_s15, %s966_s21  ;;  %s972_s23 = scalar_lea.vmem %s971_s22, 256 }
  0x3c   : > { %811 = vmatpush3.bf16.msra.mxu0 %v906_v11  ;;  %v740_v40 = vld [vmem:[%s1268_s6] ss:$0 sm:$0xff]  ;;  %p973_p11 = scmp.lt.s32.totalorder %s1215_s15, %s971_s22  ;;  %p974_p0 = scmp.lt.s32.totalorder %s972_s23, %s966_s21 }
  0x3d   : > { %812 = vmatprep.subr.bf16.mxu0 %v1040_v0  ;;  %p968_p12 = pnand %p967_p10, %p1123_p5 }
  0x3e   : > { %795 = vmatpush3.bf16.msra.mxu1 %v900_v5  ;;  %p975_p1 = por %p974_p0, %p973_p11 }
  0x3f   : > { %796 = vmatprep.subr.bf16.mxu1 %v1040_v0  ;;  %p969_p8 = pneg %p968_p12 }
  0x40   : > { %813 = vmatpush3.bf16.msra.mxu0 %v907_v12 }
  0x41   : > { %814 = vmatprep.subr.bf16.mxu0 %v1040_v0  ;;  %p976_p3 = pnand %p975_p1, %p969_p8 }
  0x42   : > { %797 = vmatpush3.bf16.msra.mxu1 %v901_v6 }
  0x43   : > { %798 = vmatprep.subr.bf16.mxu1 %v1040_v0 }
  0x44   : > { %815 = vmatpush3.bf16.msra.mxu0 %v908_v13 }
  0x45   : > { %816 = vmatprep.subr.bf16.mxu0 %v1040_v0 }
  0x46   : > { %799 = vmatpush3.bf16.msra.mxu1 %v902_v7 }
  0x47   : > { %800 = vmatprep.subr.bf16.mxu1 %v1040_v0 }
  0x48   : > { %817 = vmatpush3.bf16.msra.mxu0 %v909_v14 }
  0x49   : > { %818 = vmatprep.subr.bf16.mxu0 %v1040_v0 }
  0x4a   : > { %801 = vmatpush3.bf16.msra.mxu1 %v903_v8 }
  0x4b   : > { %802 = vmatprep.subr.bf16.mxu1 %v1040_v0 }
  0x4c   : > { %819 = vmatpush3.bf16.msra.mxu0 %v910_v15 }
  0x4d   : > { %820 = vmatprep.subr.bf16.mxu0 %v1040_v0 }
  0x4e   : > { %803 = vmatpush3.bf16.msra.mxu1 %v904_v9 }
  0x4f   : > { %804 = vmatprep.subr.bf16.mxu1 %v1040_v0 }
  0x50   : > { %821 = vmatpush3.bf16.msra.mxu0 %v911_v26 }
  0x51   : > { %822 = vmatprep.subr.bf16.mxu0 %v1040_v0 }
  0x52   : > { %805 = vmatpush3.bf16.msra.mxu1 %v905_v10 }
  0x54   : > { %823 = vmatpush3.bf16.msra.mxu0 %v912_v27 }
  0x55   : > { %824 = vmatprep.subr.bf16.mxu0 %v1040_v0 }
  0x58   : > { %825 = vmatpush3.bf16.msra.mxu0 %v913_v28 }
  0xfa   : > { %v371_v17 = vpop.f32.mrf.mxu0 }
  0xfb   : > { %v372_v19 = vadd.f32 %v727_v16, %v371_v17 }
  0xfc   : > { %v788_v18 = vpop.f32.mrf.mxu0 }
  0xfd   : > { %v378_v23 = vmax.f32 %v372_v19, 0.0 }
  0xfe   : > { %v374_v20 = vpop.f32.mrf.mxu0 }
  0xff   : > { %v375_v21 = vadd.f32 %v727_v16, %v374_v20 }
 0x100   : > { %v789_v22 = vpop.f32.mrf.mxu0 }
 0x101   : > { %v379_v24 = vmax.f32 %v375_v21, 0.0 }
 0x103   : > { %v380_v25 = vpack.c.bf16 %v379_v24, %v378_v23 }
 0x105   : > { %807 = vmatmul.mubr.bf16.vlgmr.msra.gmra.mxu1 %v380_v25 }
 0x1c5   : > { %v486_v30 = vpop.f32.mrf.mxu1 }
 0x1c6   : > { %v487_v32 = vadd.f32 %v731_v29, %v486_v30 }
 0x1c7   : > { %v808_v31 = vpop.f32.mrf.mxu1 }
 0x1c8   : > { %v493_v36 = vmax.f32 %v487_v32, 0.0 }
 0x1c9   : > { %v489_v33 = vpop.f32.mrf.mxu1 }
 0x1ca   : > { %v490_v34 = vadd.f32 %v731_v29, %v489_v33 }
 0x1cb   : > { %v809_v35 = vpop.f32.mrf.mxu1 }
 0x1cc   : > { %v494_v37 = vmax.f32 %v490_v34, 0.0 }
 0x1ce   : > { %v495_v38 = vpack.c.bf16 %v494_v37, %v493_v36 }
 0x1d0   : > { %827 = vmatmul.mubr.bf16.vlgmr.msra.gmra.mxu0 %v495_v38 }
 0x290   : > { %v601_v39 = vpop.f32.mrf.mxu0 }
 0x291   : > { %v602_v43 = vadd.f32 %v740_v40, %v601_v39 }
 0x292   : > { %v828_v41 = vpop.f32.mrf.mxu0 }
 0x294   : > { %v604_v42 = vpop.f32.mrf.mxu0 }
 0x295   : > { %v605_v44 = vadd.f32 %v740_v40, %v604_v42 }
 0x296   : > { %v829_v45 = vpop.f32.mrf.mxu0 }
 0x297   : > { %v762_v46 = vpack.c.bf16 %v605_v44, %v602_v43 }
 0x299   : > { %763 = vst [vmem:[%s302_s13] sm:$0xff] %v762_v46  }
 0x29a   : > { %979 = shalt.err (!%p976_p3)
}
 0x29b   : > { %s980_s29 = scalar_lea.hbm %s1220_s19, 128  ;;  %s984_s14 = scalar_lea.hbm %s1269_s7, 384 }
 0x29c   : > { %p981_p2 = scmp.ne.s32.totalorder %s1220_s19, %s980_s29  ;;  %p985_p7 = scmp.lt.s32.totalorder %s1220_s19, %s1269_s7 }
 0x29d   : > { %p986_p6 = scmp.lt.s32.totalorder %s984_s14, %s980_s29 }
 0x29e   : > { %p982_p4 = pnand %p981_p2, %p1123_p5 }
 0x29f   : > { %p987_p9 = por %p986_p6, %p985_p7 }
 0x2a0   : > { %p983_p13 = pneg %p982_p4 }
 0x2a2   : > { %p988_p10 = pnand %p987_p9, %p983_p13 }
 0x2a4   : > { %991 = shalt.err (!%p988_p10)
}
 0x2a5   : > { %s1043_s17 = smov 64   ;;  %s1044_s18 = smov 4  }
 0x2a6   : > { %838 = dma.vmem_to_hbm [thread:$0]  (%p1123_p5), %s1215_s15, 128, %s1220_s19, %s1222_s20, %s1043_s17, %s1043_s17, %s1044_s18  }
 0x2a7 PF: > { %p855_p12 = scmp.ge.s32.totalorder %s1034_s27, 2  ;;  %s647_s21 = sand.u32 1, %s1022_s24  }
 0x2a8   : > { %p1279_p8 = scmp.ne.s32.totalorder %s1272_s12, 0  ;;  %s648_s28 = scalar_lea.sflag [#allocation4], %s647_s21 }
 0x2aa   : > { %p848_p11 = pnand %p855_p12, %p1279_p8 }
 0x2ac   : > { %p849_p0 = pneg %p848_p11 }
 0x2ae   : > { %1017 = dma.done.wait (%p849_p0), %s648_s28, 128  }
 0x2af   : > { %1019 = vsyncadd (%p849_p0), %s648_s28, 4294967168  ;;  %p19_p1 = scmp.ge.s32.totalorder %s1110_s30, 5   ;;  %s1280_s24 = smov %s1026_s25 }
 0x2b0   : > { %s1281_s25 = smov %s1030_s26  ;;  %s1282_s26 = smov %s1121_s10 }
 0x2b1   : > { %s1283_s27 = smov %s1110_s30  ;;  %21 = sbr.rel (!%p19_p1) target bundleno = 5 (0x5), region = 92 }
 0x2b6   :  { %653 = vsyncpa [#allocation3], 1 }
 0x2b7   :  { %655 = vsyncpa [#allocation3 + $0x1], 1 }
 0x2b8   :  { %656 = vsyncpa [#allocation6], 1 }
 0x2b9   :  { %657 = vsyncpa [#allocation4], 1 }
 0x2ba   :  { %659 = vsyncpa [#allocation4 + $0x1], 1 }

</bundles_post_ra>
